<compile_context>
chip_gen: v7x
topology: tpu7x:2x2x1
jax: 0.10.0
libtpu: 0.0.40
codegen_flags: <defaults>
</compile_context>

<pallas_src>
import functools

import jax
import jax.numpy as jnp
from jax.experimental import pallas as pl
from jax.experimental.pallas import tpu as pltpu

NEG_SLOPE = 0.1
BN_EPS = 1e-5


# ----------------------------- Pallas kernel ------------------------------- #

def _shortcut_kernel(x_ref, w1_ref, b1_ref, w2_ref, b2_ref, w3_ref, b3_ref,
                     nl_ref, nr_ref, o_ref, lcr_ref,
                     *, ch, width, m, pad_off, nb):
    """Fused ShortcutBlock for NB images in channels-first (C, H*W) layout.

    lcr_ref: (3*ch, m + 2*pad_off) padded scratch.  Rows [0:ch] hold the
    left-shifted (kx=0) masked copy of y1, rows [ch:2ch] hold y1 itself
    (kx=1), rows [2ch:3ch] the right-shifted (kx=2) masked copy.  The zero
    halo borders provide the vertical (row) padding of the 3x3 conv.
    """
    f32 = jnp.float32

    # Zero only the halo borders (lane-aligned, tiny vs. the valid region).
    zeros = jnp.zeros((3 * ch, pad_off), f32)
    lcr_ref[:, :pad_off] = zeros
    lcr_ref[:, pad_off + m:] = zeros

    not_left = nl_ref[...]     # (1, M) -- kills wrap-around of column -1
    not_right = nr_ref[...]    # (1, M) -- kills wrap-around of column W

    for i in range(nb):        # small static unroll over images in this block
        x = x_ref[i]           # (C, M)

        # --- conv1 (1x1, BN scale folded into w1) + shift + LeakyReLU ------ #
        y1 = jnp.dot(w1_ref[...], x, preferred_element_type=f32)
        y1 = y1 + b1_ref[...]
        y1 = jnp.where(y1 > 0, y1, NEG_SLOPE * y1)               # (Ch, M)

        # --- build left / center / right bands of the padded scratch ------- #
        lcr_ref[ch:2 * ch, pad_off:pad_off + m] = y1             # aligned store
        left = lcr_ref[ch:2 * ch, pad_off - 1:pad_off - 1 + m] * not_left
        right = lcr_ref[ch:2 * ch, pad_off + 1:pad_off + 1 + m] * not_right
        lcr_ref[0:ch, pad_off:pad_off + m] = left
        lcr_ref[2 * ch:3 * ch, pad_off:pad_off + m] = right

        # --- conv2 (3x3, pad=1) as 3 matmuls over row-shifted slices -------- #
        # ky = 1 (no row shift) is a lane-aligned slice; ky = 0 / 2 read W
        # columns from the zero halo at the top / bottom image rows.
        y2 = jnp.dot(w2_ref[1], lcr_ref[:, pad_off:pad_off + m],
                     preferred_element_type=f32)
        off0 = pad_off - width
        y2 = y2 + jnp.dot(w2_ref[0], lcr_ref[:, off0:off0 + m],
                          preferred_element_type=f32)
        off2 = pad_off + width
        y2 = y2 + jnp.dot(w2_ref[2], lcr_ref[:, off2:off2 + m],
                          preferred_element_type=f32)
        y2 = y2 + b2_ref[...]
        y2 = jnp.where(y2 > 0, y2, NEG_SLOPE * y2)               # (Ch, M)

        # --- conv3 (1x1) + shift + LeakyReLU + residual add ----------------- #
        y3 = jnp.dot(w3_ref[...], y2, preferred_element_type=f32)
        y3 = y3 + b3_ref[...]
        y3 = jnp.where(y3 > 0, y3, NEG_SLOPE * y3)               # (C, M)
        o_ref[i] = y3 + x


# ------------------------------ JAX wrapper -------------------------------- #

def fold_bn(gamma, beta, mean, var):
    """Fold inference BatchNorm into per-channel (scale, shift), shape (C, 1)."""
    scale = gamma / jnp.sqrt(var + BN_EPS)
    shift = beta - mean * scale
    return scale[:, None], shift[:, None]


def _pick_nb(n, c, m, itemsize=4, target_bytes=512 * 1024, max_nb=8):
    """Images per grid step: enough to amortize per-step overhead, small enough
    to keep the static unroll and VMEM footprint bounded, and dividing N."""
    cap = max(1, min(max_nb, target_bytes // max(1, c * m * itemsize)))
    nb = 1
    for d in range(1, n + 1):
        if n % d == 0 and d <= cap:
            nb = d
    return nb


@jax.jit
def shortcut_block(x_nchw, params):
    """Forward pass of ShortcutBlock. Input/output: NCHW float32."""
    N, C, H, W = x_nchw.shape
    Ch = C // 2
    M = H * W
    # Lane-aligned halo width; must be >= W so every row-shifted slice stays
    # inside the zero border.
    pad_off = ((W + 1 + 127) // 128) * 128
    Mp = M + 2 * pad_off
    NB = _pick_nb(N, C, M)

    x3 = x_nchw.reshape(N, C, M)                      # contiguous, free reshape

    s1, b1 = fold_bn(*params["bn1"])                  # (Ch, 1)
    s2, b2 = fold_bn(*params["bn2"])                  # (Ch, 1)
    s3, b3 = fold_bn(*params["bn3"])                  # (C, 1)

    # Fold BN scale into the conv weights (shift stays as an in-kernel add).
    w1 = params["w1"] * s1                            # (Ch, C)
    w3 = params["w3"] * s3                            # (C, Ch)
    # (ky, kx, ci, co) -> (ky, co, kx, ci) -> (3, Ch, 3*Ch); the K order
    # (kx, ci) matches the left/center/right band layout of the scratch.
    w2 = jnp.transpose(params["w2"], (0, 3, 1, 2)).reshape(3, Ch, 3 * Ch)
    w2 = w2 * s2.reshape(1, Ch, 1)

    # Column-edge masks for the flattened spatial index (handle W boundaries).
    col = jnp.arange(M, dtype=jnp.int32) % W
    not_left = (col != 0).astype(jnp.float32)[None, :]        # (1, M)
    not_right = (col != W - 1).astype(jnp.float32)[None, :]   # (1, M)

    kernel = functools.partial(_shortcut_kernel, ch=Ch, width=W, m=M,
                               pad_off=pad_off, nb=NB)

    def const_spec(a):
        # Resident block: same block index every grid step -> no re-DMA.
        if a.ndim == 3:
            return pl.BlockSpec(a.shape, lambda n: (0, 0, 0))
        return pl.BlockSpec(a.shape, lambda n: (0, 0))

    out = pl.pallas_call(
        kernel,
        out_shape=jax.ShapeDtypeStruct((N, C, M), jnp.float32),
        grid_spec=pltpu.PrefetchScalarGridSpec(
            num_scalar_prefetch=0,
            grid=(N // NB,),
            in_specs=[
                pl.BlockSpec((NB, C, M), lambda n: (n, 0, 0)),  # x (streamed)
                const_spec(w1), const_spec(b1),                 # conv1
                const_spec(w2), const_spec(b2),                 # conv2 (3,Ch,3Ch)
                const_spec(w3), const_spec(b3),                 # conv3
                const_spec(not_left), const_spec(not_right),    # edge masks
            ],
            out_specs=pl.BlockSpec((NB, C, M), lambda n: (n, 0, 0)),
            scratch_shapes=[pltpu.VMEM((3 * Ch, Mp), jnp.float32)],
        ),
        compiler_params=pltpu.CompilerParams(
            dimension_semantics=("parallel",)),   # shard batch across TCs (v7x)
    )(x3, w1, b1, w2, b2, w3, b3, not_left, not_right)

    return out.reshape(N, C, H, W)


# ------------------------------- Reference --------------------------------- #

def reference(x_nchw, params):
    def bn_lrelu(y, bn):
        gamma, beta, mean, var = bn
        rs = lambda p: p.reshape(1, -1, 1, 1)
        y = (y - rs(mean)) / jnp.sqrt(rs(var) + BN_EPS) * rs(gamma) + rs(beta)
        return jnp.where(y > 0, y, NEG_SLOPE * y)

    x = x_nchw.astype(jnp.float32)
    y = jnp.einsum("nchw,oc->nohw", x, params["w1"])
    y = bn_lrelu(y, params["bn1"])
    y = jax.lax.conv_general_dilated(
        y, params["w2"], window_strides=(1, 1), padding="SAME",
        dimension_numbers=("NCHW", "HWIO", "NCHW"))
    y = bn_lrelu(y, params["bn2"])
    y = jnp.einsum("nchw,oc->nohw", y, params["w3"])
    y = bn_lrelu(y, params["bn3"])
    return y + x


# --------------------------------- Main ------------------------------------ #

def make_params(key, channels):
    Ch = channels // 2
    ks = jax.random.split(key, 12)

    def bn_params(kg, kb, km, kv, c):
        gamma = 1.0 + 0.1 * jax.random.normal(kg, (c,), jnp.float32)
        beta = 0.1 * jax.random.normal(kb, (c,), jnp.float32)
        mean = 0.1 * jax.random.normal(km, (c,), jnp.float32)
        var = jnp.abs(jax.random.normal(kv, (c,), jnp.float32)) + 0.5
        return (gamma, beta, mean, var)

    return {
        # 1x1 conv weights stored as (Cout, Cin); 3x3 conv stored HWIO
        "w1": 0.2 * jax.random.normal(ks[0], (Ch, channels), jnp.float32),
        "w2": 0.2 * jax.random.normal(ks[1], (3, 3, Ch, Ch), jnp.float32),
        "w3": 0.2 * jax.random.normal(ks[2], (channels, Ch), jnp.float32),
        "bn1": bn_params(ks[3], ks[4], ks[5], ks[6], Ch),
        "bn2": bn_params(ks[7], ks[8], ks[9], ks[10], Ch),
        "bn3": bn_params(ks[11], ks[3], ks[4], ks[5], channels),
    }


if __name__ == "__main__":
    key = jax.random.PRNGKey(0)
    kx, kp = jax.random.split(key)

    N, C, H, W = 2, 4, 16, 16
    x = jax.random.normal(kx, (N, C, H, W), jnp.float32)
    params = make_params(kp, C)

    out = shortcut_block(x, params)
    out = jax.block_until_ready(out)

    ref = reference(x, params)
    assert out.shape == (N, C, H, W), out.shape
    assert jnp.allclose(out, ref, rtol=1e-4, atol=1e-4), (
        float(jnp.max(jnp.abs(out - ref))))

    print("KERNEL_OK")
</pallas_src>

<mosaic_0001>
module attributes {stable_mosaic.version = 11 : i64} {
  func.func @_shortcut_kernel(%arg0: i32, %arg1: memref<2x4x256xf32, #tpu.memory_space<vmem>>, %arg2: memref<2x4xf32, #tpu.memory_space<vmem>>, %arg3: memref<2x1xf32, #tpu.memory_space<vmem>>, %arg4: memref<3x2x6xf32, #tpu.memory_space<vmem>>, %arg5: memref<2x1xf32, #tpu.memory_space<vmem>>, %arg6: memref<4x2xf32, #tpu.memory_space<vmem>>, %arg7: memref<4x1xf32, #tpu.memory_space<vmem>>, %arg8: memref<1x256xf32, #tpu.memory_space<vmem>>, %arg9: memref<1x256xf32, #tpu.memory_space<vmem>>, %arg10: memref<2x4x256xf32, #tpu.memory_space<vmem>>, %arg11: memref<6x512xf32, #tpu.memory_space<vmem>>) attributes {dimension_semantics = [#tpu.dimension_semantics<parallel>], iteration_bounds = array<i64: 1>, scalar_prefetch = 0 : i64, scratch_operands = 1 : i64, tpu.core_type = #tpu.core_type<tc>, window_params = [{transform_indices = @transform_0, window_bounds = array<i64: 2, 4, 256>}, {pipeline_mode = #tpu.pipeline_mode<synchronous>, transform_indices = @transform_1, window_bounds = array<i64: 2, 4>}, {pipeline_mode = #tpu.pipeline_mode<synchronous>, transform_indices = @transform_2, window_bounds = array<i64: 2, 1>}, {pipeline_mode = #tpu.pipeline_mode<synchronous>, transform_indices = @transform_3, window_bounds = array<i64: 3, 2, 6>}, {pipeline_mode = #tpu.pipeline_mode<synchronous>, transform_indices = @transform_4, window_bounds = array<i64: 2, 1>}, {pipeline_mode = #tpu.pipeline_mode<synchronous>, transform_indices = @transform_5, window_bounds = array<i64: 4, 2>}, {pipeline_mode = #tpu.pipeline_mode<synchronous>, transform_indices = @transform_6, window_bounds = array<i64: 4, 1>}, {pipeline_mode = #tpu.pipeline_mode<synchronous>, transform_indices = @transform_7, window_bounds = array<i64: 1, 256>}, {pipeline_mode = #tpu.pipeline_mode<synchronous>, transform_indices = @transform_8, window_bounds = array<i64: 1, 256>}, {transform_indices = @transform_9, window_bounds = array<i64: 2, 4, 256>}]} {
    %cst = arith.constant 0.000000e+00 : f32
    %0 = vector.broadcast %cst : f32 to vector<6x128xf32>
    %c0 = arith.constant 0 : index
    %c0_0 = arith.constant 0 : index
    %1 = vector.load %arg11[%c0, %c0_0] : memref<6x512xf32, #tpu.memory_space<vmem>>, vector<6x128xf32>
    tpu.vector_store %arg11[%c0, %c0_0], %0 {strides = array<i32>} : memref<6x512xf32, #tpu.memory_space<vmem>>, vector<6x128xf32>,
    %c0_1 = arith.constant 0 : index
    %c384 = arith.constant 384 : index
    %2 = vector.load %arg11[%c0_1, %c384] : memref<6x512xf32, #tpu.memory_space<vmem>>, vector<6x128xf32>
    tpu.vector_store %arg11[%c0_1, %c384], %0 {strides = array<i32>} : memref<6x512xf32, #tpu.memory_space<vmem>>, vector<6x128xf32>,
    %c0_2 = arith.constant 0 : index
    %c0_3 = arith.constant 0 : index
    %3 = vector.load %arg8[%c0_2, %c0_3] : memref<1x256xf32, #tpu.memory_space<vmem>>, vector<1x256xf32>
    %c0_4 = arith.constant 0 : index
    %c0_5 = arith.constant 0 : index
    %4 = vector.load %arg9[%c0_4, %c0_5] : memref<1x256xf32, #tpu.memory_space<vmem>>, vector<1x256xf32>
    %c0_6 = arith.constant 0 : index
    %c0_7 = arith.constant 0 : index
    %c0_8 = arith.constant 0 : index
    %5 = vector.load %arg1[%c0_6, %c0_7, %c0_8] : memref<2x4x256xf32, #tpu.memory_space<vmem>>, vector<1x4x256xf32>
    %6 = vector.shape_cast %5 : vector<1x4x256xf32> to vector<4x256xf32>
    %c0_9 = arith.constant 0 : index
    %c0_10 = arith.constant 0 : index
    %7 = vector.load %arg2[%c0_9, %c0_10] : memref<2x4xf32, #tpu.memory_space<vmem>>, vector<2x4xf32>
    %cst_11 = arith.constant dense<0.000000e+00> : vector<2x256xf32>
    %8 = tpu.matmul %7, %6, %cst_11 {dimension_numbers = #tpu.dot_dimension_numbers<[1], [0], [0], [1], [0, 0, 1, 1], [], []>} : vector<2x4xf32>, vector<4x256xf32>, vector<2x256xf32> -> vector<2x256xf32>
    %c0_12 = arith.constant 0 : index
    %c0_13 = arith.constant 0 : index
    %9 = vector.load %arg3[%c0_12, %c0_13] : memref<2x1xf32, #tpu.memory_space<vmem>>, vector<2x1xf32>
    %10 = vector.broadcast %9 : vector<2x1xf32> to vector<2x256xf32>
    %11 = arith.addf %8, %10 : vector<2x256xf32>
    %cst_14 = arith.constant 0.000000e+00 : f32
    %12 = vector.broadcast %cst_14 : f32 to vector<2x256xf32>
    %13 = arith.cmpf ogt, %11, %12 : vector<2x256xf32>
    %cst_15 = arith.constant 1.000000e-01 : f32
    %14 = vector.broadcast %cst_15 : f32 to vector<2x256xf32>
    %15 = arith.mulf %14, %11 : vector<2x256xf32>
    %16 = arith.select %13, %11, %15 : vector<2x256xi1>, vector<2x256xf32>
    %c2 = arith.constant 2 : index
    %c128 = arith.constant 128 : index
    %17 = vector.load %arg11[%c2, %c128] : memref<6x512xf32, #tpu.memory_space<vmem>>, vector<2x256xf32>
    tpu.vector_store %arg11[%c2, %c128], %16 {strides = array<i32>} : memref<6x512xf32, #tpu.memory_space<vmem>>, vector<2x256xf32>,
    %c2_16 = arith.constant 2 : index
    %c127 = arith.constant 127 : index
    %18 = vector.load %arg11[%c2_16, %c127] : memref<6x512xf32, #tpu.memory_space<vmem>>, vector<2x256xf32>
    %19 = vector.broadcast %3 : vector<1x256xf32> to vector<2x256xf32>
    %20 = arith.mulf %18, %19 : vector<2x256xf32>
    %c2_17 = arith.constant 2 : index
    %c129 = arith.constant 129 : index
    %21 = vector.load %arg11[%c2_17, %c129] : memref<6x512xf32, #tpu.memory_space<vmem>>, vector<2x256xf32>
    %22 = vector.broadcast %4 : vector<1x256xf32> to vector<2x256xf32>
    %23 = arith.mulf %21, %22 : vector<2x256xf32>
    %c0_18 = arith.constant 0 : index
    %c128_19 = arith.constant 128 : index
    %24 = vector.load %arg11[%c0_18, %c128_19] : memref<6x512xf32, #tpu.memory_space<vmem>>, vector<2x256xf32>
    tpu.vector_store %arg11[%c0_18, %c128_19], %20 {strides = array<i32>} : memref<6x512xf32, #tpu.memory_space<vmem>>, vector<2x256xf32>,
    %c4 = arith.constant 4 : index
    %c128_20 = arith.constant 128 : index
    %25 = vector.load %arg11[%c4, %c128_20] : memref<6x512xf32, #tpu.memory_space<vmem>>, vector<2x256xf32>
    tpu.vector_store %arg11[%c4, %c128_20], %23 {strides = array<i32>} : memref<6x512xf32, #tpu.memory_space<vmem>>, vector<2x256xf32>,
    %c1 = arith.constant 1 : index
    %c0_21 = arith.constant 0 : index
    %c0_22 = arith.constant 0 : index
    %26 = vector.load %arg4[%c1, %c0_21, %c0_22] : memref<3x2x6xf32, #tpu.memory_space<vmem>>, vector<1x2x6xf32>
    %27 = vector.shape_cast %26 : vector<1x2x6xf32> to vector<2x6xf32>
    %c0_23 = arith.constant 0 : index
    %c128_24 = arith.constant 128 : index
    %28 = vector.load %arg11[%c0_23, %c128_24] : memref<6x512xf32, #tpu.memory_space<vmem>>, vector<6x256xf32>
    %cst_25 = arith.constant dense<0.000000e+00> : vector<2x256xf32>
    %29 = tpu.matmul %27, %28, %cst_25 {dimension_numbers = #tpu.dot_dimension_numbers<[1], [0], [0], [1], [0, 0, 1, 1], [], []>} : vector<2x6xf32>, vector<6x256xf32>, vector<2x256xf32> -> vector<2x256xf32>
    %c0_26 = arith.constant 0 : index
    %c0_27 = arith.constant 0 : index
    %c0_28 = arith.constant 0 : index
    %30 = vector.load %arg4[%c0_26, %c0_27, %c0_28] : memref<3x2x6xf32, #tpu.memory_space<vmem>>, vector<1x2x6xf32>
    %31 = vector.shape_cast %30 : vector<1x2x6xf32> to vector<2x6xf32>
    %c0_29 = arith.constant 0 : index
    %c112 = arith.constant 112 : index
    %32 = vector.load %arg11[%c0_29, %c112] : memref<6x512xf32, #tpu.memory_space<vmem>>, vector<6x256xf32>
    %cst_30 = arith.constant dense<0.000000e+00> : vector<2x256xf32>
    %33 = tpu.matmul %31, %32, %cst_30 {dimension_numbers = #tpu.dot_dimension_numbers<[1], [0], [0], [1], [0, 0, 1, 1], [], []>} : vector<2x6xf32>, vector<6x256xf32>, vector<2x256xf32> -> vector<2x256xf32>
    %34 = arith.addf %29, %33 : vector<2x256xf32>
    %c2_31 = arith.constant 2 : index
    %c0_32 = arith.constant 0 : index
    %c0_33 = arith.constant 0 : index
    %35 = vector.load %arg4[%c2_31, %c0_32, %c0_33] : memref<3x2x6xf32, #tpu.memory_space<vmem>>, vector<1x2x6xf32>
    %36 = vector.shape_cast %35 : vector<1x2x6xf32> to vector<2x6xf32>
    %c0_34 = arith.constant 0 : index
    %c144 = arith.constant 144 : index
    %37 = vector.load %arg11[%c0_34, %c144] : memref<6x512xf32, #tpu.memory_space<vmem>>, vector<6x256xf32>
    %cst_35 = arith.constant dense<0.000000e+00> : vector<2x256xf32>
    %38 = tpu.matmul %36, %37, %cst_35 {dimension_numbers = #tpu.dot_dimension_numbers<[1], [0], [0], [1], [0, 0, 1, 1], [], []>} : vector<2x6xf32>, vector<6x256xf32>, vector<2x256xf32> -> vector<2x256xf32>
    %39 = arith.addf %34, %38 : vector<2x256xf32>
    %c0_36 = arith.constant 0 : index
    %c0_37 = arith.constant 0 : index
    %40 = vector.load %arg5[%c0_36, %c0_37] : memref<2x1xf32, #tpu.memory_space<vmem>>, vector<2x1xf32>
    %41 = vector.broadcast %40 : vector<2x1xf32> to vector<2x256xf32>
    %42 = arith.addf %39, %41 : vector<2x256xf32>
    %cst_38 = arith.constant 0.000000e+00 : f32
    %43 = vector.broadcast %cst_38 : f32 to vector<2x256xf32>
    %44 = arith.cmpf ogt, %42, %43 : vector<2x256xf32>
    %cst_39 = arith.constant 1.000000e-01 : f32
    %45 = vector.broadcast %cst_39 : f32 to vector<2x256xf32>
    %46 = arith.mulf %45, %42 : vector<2x256xf32>
    %47 = arith.select %44, %42, %46 : vector<2x256xi1>, vector<2x256xf32>
    %c0_40 = arith.constant 0 : index
    %c0_41 = arith.constant 0 : index
    %48 = vector.load %arg6[%c0_40, %c0_41] : memref<4x2xf32, #tpu.memory_space<vmem>>, vector<4x2xf32>
    %cst_42 = arith.constant dense<0.000000e+00> : vector<4x256xf32>
    %49 = tpu.matmul %48, %47, %cst_42 {dimension_numbers = #tpu.dot_dimension_numbers<[1], [0], [0], [1], [0, 0, 1, 1], [], []>} : vector<4x2xf32>, vector<2x256xf32>, vector<4x256xf32> -> vector<4x256xf32>
    %c0_43 = arith.constant 0 : index
    %c0_44 = arith.constant 0 : index
    %50 = vector.load %arg7[%c0_43, %c0_44] : memref<4x1xf32, #tpu.memory_space<vmem>>, vector<4x1xf32>
    %51 = vector.broadcast %50 : vector<4x1xf32> to vector<4x256xf32>
    %52 = arith.addf %49, %51 : vector<4x256xf32>
    %cst_45 = arith.constant 0.000000e+00 : f32
    %53 = vector.broadcast %cst_45 : f32 to vector<4x256xf32>
    %54 = arith.cmpf ogt, %52, %53 : vector<4x256xf32>
    %cst_46 = arith.constant 1.000000e-01 : f32
    %55 = vector.broadcast %cst_46 : f32 to vector<4x256xf32>
    %56 = arith.mulf %55, %52 : vector<4x256xf32>
    %57 = arith.select %54, %52, %56 : vector<4x256xi1>, vector<4x256xf32>
    %58 = arith.addf %57, %6 : vector<4x256xf32>
    %c0_47 = arith.constant 0 : index
    %c0_48 = arith.constant 0 : index
    %c0_49 = arith.constant 0 : index
    %59 = vector.load %arg10[%c0_47, %c0_48, %c0_49] : memref<2x4x256xf32, #tpu.memory_space<vmem>>, vector<1x4x256xf32>
    %60 = vector.shape_cast %59 : vector<1x4x256xf32> to vector<4x256xf32>
    %61 = vector.shape_cast %58 : vector<4x256xf32> to vector<1x4x256xf32>
    tpu.vector_store %arg10[%c0_47, %c0_48, %c0_49], %61 {strides = array<i32>} : memref<2x4x256xf32, #tpu.memory_space<vmem>>, vector<1x4x256xf32>,
    %c1_50 = arith.constant 1 : index
    %c0_51 = arith.constant 0 : index
    %c0_52 = arith.constant 0 : index
    %62 = vector.load %arg1[%c1_50, %c0_51, %c0_52] : memref<2x4x256xf32, #tpu.memory_space<vmem>>, vector<1x4x256xf32>
    %63 = vector.shape_cast %62 : vector<1x4x256xf32> to vector<4x256xf32>
    %c0_53 = arith.constant 0 : index
    %c0_54 = arith.constant 0 : index
    %64 = vector.load %arg2[%c0_53, %c0_54] : memref<2x4xf32, #tpu.memory_space<vmem>>, vector<2x4xf32>
    %cst_55 = arith.constant dense<0.000000e+00> : vector<2x256xf32>
    %65 = tpu.matmul %64, %63, %cst_55 {dimension_numbers = #tpu.dot_dimension_numbers<[1], [0], [0], [1], [0, 0, 1, 1], [], []>} : vector<2x4xf32>, vector<4x256xf32>, vector<2x256xf32> -> vector<2x256xf32>
    %c0_56 = arith.constant 0 : index
    %c0_57 = arith.constant 0 : index
    %66 = vector.load %arg3[%c0_56, %c0_57] : memref<2x1xf32, #tpu.memory_space<vmem>>, vector<2x1xf32>
    %67 = vector.broadcast %66 : vector<2x1xf32> to vector<2x256xf32>
    %68 = arith.addf %65, %67 : vector<2x256xf32>
    %cst_58 = arith.constant 0.000000e+00 : f32
    %69 = vector.broadcast %cst_58 : f32 to vector<2x256xf32>
    %70 = arith.cmpf ogt, %68, %69 : vector<2x256xf32>
    %cst_59 = arith.constant 1.000000e-01 : f32
    %71 = vector.broadcast %cst_59 : f32 to vector<2x256xf32>
    %72 = arith.mulf %71, %68 : vector<2x256xf32>
    %73 = arith.select %70, %68, %72 : vector<2x256xi1>, vector<2x256xf32>
    %c2_60 = arith.constant 2 : index
    %c128_61 = arith.constant 128 : index
    %74 = vector.load %arg11[%c2_60, %c128_61] : memref<6x512xf32, #tpu.memory_space<vmem>>, vector<2x256xf32>
    tpu.vector_store %arg11[%c2_60, %c128_61], %73 {strides = array<i32>} : memref<6x512xf32, #tpu.memory_space<vmem>>, vector<2x256xf32>,
    %c2_62 = arith.constant 2 : index
    %c127_63 = arith.constant 127 : index
    %75 = vector.load %arg11[%c2_62, %c127_63] : memref<6x512xf32, #tpu.memory_space<vmem>>, vector<2x256xf32>
    %76 = vector.broadcast %3 : vector<1x256xf32> to vector<2x256xf32>
    %77 = arith.mulf %75, %76 : vector<2x256xf32>
    %c2_64 = arith.constant 2 : index
    %c129_65 = arith.constant 129 : index
    %78 = vector.load %arg11[%c2_64, %c129_65] : memref<6x512xf32, #tpu.memory_space<vmem>>, vector<2x256xf32>
    %79 = vector.broadcast %4 : vector<1x256xf32> to vector<2x256xf32>
    %80 = arith.mulf %78, %79 : vector<2x256xf32>
    %c0_66 = arith.constant 0 : index
    %c128_67 = arith.constant 128 : index
    %81 = vector.load %arg11[%c0_66, %c128_67] : memref<6x512xf32, #tpu.memory_space<vmem>>, vector<2x256xf32>
    tpu.vector_store %arg11[%c0_66, %c128_67], %77 {strides = array<i32>} : memref<6x512xf32, #tpu.memory_space<vmem>>, vector<2x256xf32>,
    %c4_68 = arith.constant 4 : index
    %c128_69 = arith.constant 128 : index
    %82 = vector.load %arg11[%c4_68, %c128_69] : memref<6x512xf32, #tpu.memory_space<vmem>>, vector<2x256xf32>
    tpu.vector_store %arg11[%c4_68, %c128_69], %80 {strides = array<i32>} : memref<6x512xf32, #tpu.memory_space<vmem>>, vector<2x256xf32>,
    %c1_70 = arith.constant 1 : index
    %c0_71 = arith.constant 0 : index
    %c0_72 = arith.constant 0 : index
    %83 = vector.load %arg4[%c1_70, %c0_71, %c0_72] : memref<3x2x6xf32, #tpu.memory_space<vmem>>, vector<1x2x6xf32>
    %84 = vector.shape_cast %83 : vector<1x2x6xf32> to vector<2x6xf32>
    %c0_73 = arith.constant 0 : index
    %c128_74 = arith.constant 128 : index
    %85 = vector.load %arg11[%c0_73, %c128_74] : memref<6x512xf32, #tpu.memory_space<vmem>>, vector<6x256xf32>
    %cst_75 = arith.constant dense<0.000000e+00> : vector<2x256xf32>
    %86 = tpu.matmul %84, %85, %cst_75 {dimension_numbers = #tpu.dot_dimension_numbers<[1], [0], [0], [1], [0, 0, 1, 1], [], []>} : vector<2x6xf32>, vector<6x256xf32>, vector<2x256xf32> -> vector<2x256xf32>
    %c0_76 = arith.constant 0 : index
    %c0_77 = arith.constant 0 : index
    %c0_78 = arith.constant 0 : index
    %87 = vector.load %arg4[%c0_76, %c0_77, %c0_78] : memref<3x2x6xf32, #tpu.memory_space<vmem>>, vector<1x2x6xf32>
    %88 = vector.shape_cast %87 : vector<1x2x6xf32> to vector<2x6xf32>
    %c0_79 = arith.constant 0 : index
    %c112_80 = arith.constant 112 : index
    %89 = vector.load %arg11[%c0_79, %c112_80] : memref<6x512xf32, #tpu.memory_space<vmem>>, vector<6x256xf32>
    %cst_81 = arith.constant dense<0.000000e+00> : vector<2x256xf32>
    %90 = tpu.matmul %88, %89, %cst_81 {dimension_numbers = #tpu.dot_dimension_numbers<[1], [0], [0], [1], [0, 0, 1, 1], [], []>} : vector<2x6xf32>, vector<6x256xf32>, vector<2x256xf32> -> vector<2x256xf32>
    %91 = arith.addf %86, %90 : vector<2x256xf32>
    %c2_82 = arith.constant 2 : index
    %c0_83 = arith.constant 0 : index
    %c0_84 = arith.constant 0 : index
    %92 = vector.load %arg4[%c2_82, %c0_83, %c0_84] : memref<3x2x6xf32, #tpu.memory_space<vmem>>, vector<1x2x6xf32>
    %93 = vector.shape_cast %92 : vector<1x2x6xf32> to vector<2x6xf32>
    %c0_85 = arith.constant 0 : index
    %c144_86 = arith.constant 144 : index
    %94 = vector.load %arg11[%c0_85, %c144_86] : memref<6x512xf32, #tpu.memory_space<vmem>>, vector<6x256xf32>
    %cst_87 = arith.constant dense<0.000000e+00> : vector<2x256xf32>
    %95 = tpu.matmul %93, %94, %cst_87 {dimension_numbers = #tpu.dot_dimension_numbers<[1], [0], [0], [1], [0, 0, 1, 1], [], []>} : vector<2x6xf32>, vector<6x256xf32>, vector<2x256xf32> -> vector<2x256xf32>
    %96 = arith.addf %91, %95 : vector<2x256xf32>
    %c0_88 = arith.constant 0 : index
    %c0_89 = arith.constant 0 : index
    %97 = vector.load %arg5[%c0_88, %c0_89] : memref<2x1xf32, #tpu.memory_space<vmem>>, vector<2x1xf32>
    %98 = vector.broadcast %97 : vector<2x1xf32> to vector<2x256xf32>
    %99 = arith.addf %96, %98 : vector<2x256xf32>
    %cst_90 = arith.constant 0.000000e+00 : f32
    %100 = vector.broadcast %cst_90 : f32 to vector<2x256xf32>
    %101 = arith.cmpf ogt, %99, %100 : vector<2x256xf32>
    %cst_91 = arith.constant 1.000000e-01 : f32
    %102 = vector.broadcast %cst_91 : f32 to vector<2x256xf32>
    %103 = arith.mulf %102, %99 : vector<2x256xf32>
    %104 = arith.select %101, %99, %103 : vector<2x256xi1>, vector<2x256xf32>
    %c0_92 = arith.constant 0 : index
    %c0_93 = arith.constant 0 : index
    %105 = vector.load %arg6[%c0_92, %c0_93] : memref<4x2xf32, #tpu.memory_space<vmem>>, vector<4x2xf32>
    %cst_94 = arith.constant dense<0.000000e+00> : vector<4x256xf32>
    %106 = tpu.matmul %105, %104, %cst_94 {dimension_numbers = #tpu.dot_dimension_numbers<[1], [0], [0], [1], [0, 0, 1, 1], [], []>} : vector<4x2xf32>, vector<2x256xf32>, vector<4x256xf32> -> vector<4x256xf32>
    %c0_95 = arith.constant 0 : index
    %c0_96 = arith.constant 0 : index
    %107 = vector.load %arg7[%c0_95, %c0_96] : memref<4x1xf32, #tpu.memory_space<vmem>>, vector<4x1xf32>
    %108 = vector.broadcast %107 : vector<4x1xf32> to vector<4x256xf32>
    %109 = arith.addf %106, %108 : vector<4x256xf32>
    %cst_97 = arith.constant 0.000000e+00 : f32
    %110 = vector.broadcast %cst_97 : f32 to vector<4x256xf32>
    %111 = arith.cmpf ogt, %109, %110 : vector<4x256xf32>
    %cst_98 = arith.constant 1.000000e-01 : f32
    %112 = vector.broadcast %cst_98 : f32 to vector<4x256xf32>
    %113 = arith.mulf %112, %109 : vector<4x256xf32>
    %114 = arith.select %111, %109, %113 : vector<4x256xi1>, vector<4x256xf32>
    %115 = arith.addf %114, %63 : vector<4x256xf32>
    %c1_99 = arith.constant 1 : index
    %c0_100 = arith.constant 0 : index
    %c0_101 = arith.constant 0 : index
    %116 = vector.load %arg10[%c1_99, %c0_100, %c0_101] : memref<2x4x256xf32, #tpu.memory_space<vmem>>, vector<1x4x256xf32>
    %117 = vector.shape_cast %116 : vector<1x4x256xf32> to vector<4x256xf32>
    %118 = vector.shape_cast %115 : vector<4x256xf32> to vector<1x4x256xf32>
    tpu.vector_store %arg10[%c1_99, %c0_100, %c0_101], %118 {strides = array<i32>} : memref<2x4x256xf32, #tpu.memory_space<vmem>>, vector<1x4x256xf32>,
    return
  }
  func.func @transform_0(%arg0: i32) -> (i32, i32, i32) {
    %c0_i32 = arith.constant 0 : i32
    %c0_i32_0 = arith.constant 0 : i32
    %c0_i32_1 = arith.constant 0 : i32
    return %arg0, %c0_i32, %c0_i32_0 : i32, i32, i32
  }
  func.func @transform_1(%arg0: i32) -> (i32, i32) {
    %c0_i32 = arith.constant 0 : i32
    %c0_i32_0 = arith.constant 0 : i32
    %c0_i32_1 = arith.constant 0 : i32
    return %c0_i32, %c0_i32_0 : i32, i32
  }
  func.func @transform_2(%arg0: i32) -> (i32, i32) {
    %c0_i32 = arith.constant 0 : i32
    %c0_i32_0 = arith.constant 0 : i32
    %c0_i32_1 = arith.constant 0 : i32
    return %c0_i32, %c0_i32_0 : i32, i32
  }
  func.func @transform_3(%arg0: i32) -> (i32, i32, i32) {
    %c0_i32 = arith.constant 0 : i32
    %c0_i32_0 = arith.constant 0 : i32
    %c0_i32_1 = arith.constant 0 : i32
    %c0_i32_2 = arith.constant 0 : i32
    return %c0_i32, %c0_i32_0, %c0_i32_1 : i32, i32, i32
  }
  func.func @transform_4(%arg0: i32) -> (i32, i32) {
    %c0_i32 = arith.constant 0 : i32
    %c0_i32_0 = arith.constant 0 : i32
    %c0_i32_1 = arith.constant 0 : i32
    return %c0_i32, %c0_i32_0 : i32, i32
  }
  func.func @transform_5(%arg0: i32) -> (i32, i32) {
    %c0_i32 = arith.constant 0 : i32
    %c0_i32_0 = arith.constant 0 : i32
    %c0_i32_1 = arith.constant 0 : i32
    return %c0_i32, %c0_i32_0 : i32, i32
  }
  func.func @transform_6(%arg0: i32) -> (i32, i32) {
    %c0_i32 = arith.constant 0 : i32
    %c0_i32_0 = arith.constant 0 : i32
    %c0_i32_1 = arith.constant 0 : i32
    return %c0_i32, %c0_i32_0 : i32, i32
  }
  func.func @transform_7(%arg0: i32) -> (i32, i32) {
    %c0_i32 = arith.constant 0 : i32
    %c0_i32_0 = arith.constant 0 : i32
    %c0_i32_1 = arith.constant 0 : i32
    return %c0_i32, %c0_i32_0 : i32, i32
  }
  func.func @transform_8(%arg0: i32) -> (i32, i32) {
    %c0_i32 = arith.constant 0 : i32
    %c0_i32_0 = arith.constant 0 : i32
    %c0_i32_1 = arith.constant 0 : i32
    return %c0_i32, %c0_i32_0 : i32, i32
  }
  func.func @transform_9(%arg0: i32) -> (i32, i32, i32) {
    %c0_i32 = arith.constant 0 : i32
    %c0_i32_0 = arith.constant 0 : i32
    %c0_i32_1 = arith.constant 0 : i32
    return %arg0, %c0_i32, %c0_i32_0 : i32, i32, i32
  }
}

</mosaic_0001>

<bundles_post_ra>
// kernel: shortcut_block.1
= control target key start
LH: loop header
LB: loop body
LE: loop exit
PB: predicated region body
PF: predicated region fallthrough
CT: control target
= control target key end

     0   :  { %vm50_vm0 = vcmask 1043456   ;;  %v1202_v1 = vmov 0.0   ;;  %v1203_v2 = vmov 0   ;;  %v144_v3 = vlaneseq  ;;  %s1204_s19 = smov 127   ;;  %s1207_s20 = smov 112   ;;  %s1466_s0 = inlined_call_operand.vmem [shape: f32[2,4,256], index: 0, kind: input, shape index: {}]   ;;  %s1467_s1 = inlined_call_operand.vmem [shape: f32[2,4], index: 1, kind: input, shape index: {}]   ;;  %s1468_s2 = inlined_call_operand.vmem [shape: f32[2,1], index: 2, kind: input, shape index: {}]   ;;  %s1469_s7 = inlined_call_operand.vmem [shape: f32[1,256], index: 7, kind: input, shape index: {}]   ;;  %s1470_s8 = inlined_call_operand.vmem [shape: f32[1,256], index: 8, kind: input, shape index: {}]   ;;  %s1471_s4 = inlined_call_operand.vmem [shape: f32[2,1], index: 4, kind: input, shape index: {}]   ;;  %s1472_s3 = inlined_call_operand.vmem [shape: f32[3,2,6], index: 3, kind: input, shape index: {}]   ;;  %s1473_s5 = inlined_call_operand.vmem [shape: f32[4,2], index: 5, kind: input, shape index: {}]   ;;  %s1474_s6 = inlined_call_operand.vmem [shape: f32[4,1], index: 6, kind: input, shape index: {}]   ;;  %s1475_s9 = inlined_call_operand.vmem [shape: f32[2,4,256], index: 9, kind: output, shape index: {}]  }
   0x1   :  { %v1261_v0 = vld [vmem:[%s1466_s0] sm:$0xff]  ;;  %119 = vmatprep.mubr.f32.mxu1 %v1202_v1  ;;  %32 = vst [vmem:[#allocation2] sm:$0x3f] %v1202_v1  ;;  %33 = vst [vmem:[#allocation2 + $0x18] sm:$0x3f] %v1202_v1  ;;  %1198 = vset.pattern.permute.xlu0 %v1203_v2  ;;  %vm46_vm1 = vcmask 31744  }
   0x2   :  { %v1268_v4 = vcombine.high %v1261_v0, %v1261_v0  ;;  %v38_v5 = vld [vmem:[%s1468_s2] sm:$0x3]  ;;  %1199 = vset.pattern.permute.xlu1 %v1203_v2  ;;  %591 = vmatprep.mubr.f32.mxu0 %v1202_v1  ;;  %v145_v7 = vshrl.u32 %v144_v3, 7  ;;  %vm156_vm4 = vcmask 1039360   ;;  %vm178_vm5 = vcmask 7168  }
   0x3   :  { %v37_v6 = vld [vmem:[%s1467_s1] sm:$0x3]  ;;  %41 = vperm.xlu0 %1198, %v38_v5   ;;  %vm237_vm6 = vcmask 130048   ;;  %vm244_vm7 = vcmask 1045504   ;;  %vm240_vm8 = vcmask 48128   ;;  %vm412_vm9 = vcmask 916480  }
   0x4   :  { %1148 = vmatprep.subr.msk.mxu1 %vm50_vm0, %v1268_v4  ;;  %v34_v8 = vld [vmem:[%s1469_s7] sm:$0x3]  ;;  %v146_v9 = vsub.s32 0, %v145_v7  ;;  %v150_v10 = vsub.s32 1, %v145_v7  ;;  %s1205_s7 = smov 1   ;;  %vm520_vm11 = vcmask 1041408  }
   0x5   :  { %1149 = vmatpush1.msk.msra.mxu1 %vm50_vm0, %v1261_v0  ;;  %v35_v11 = vld [vmem:[%s1470_s8] sm:$0x3]  ;;  %s1206_s8 = smov 16   ;;  %vm516_vm13 = vcmask 15360  }
   0x6   :  { %1150 = vmatmul.mubr.msk.f32.vlgmr.msra.gmra.mrb[0].mxu1 %vm46_vm1, %v37_v6  ;;  %v151_v12 = vrot.slane %v34_v8, %v150_v10  ;;  %v147_v13 = vrot.slane %v34_v8, %v146_v9  ;;  %v169_v14 = vrot.slane %v35_v11, %v146_v9  ;;  %v173_v15 = vrot.slane %v35_v11, %v150_v10  ;;  %v495_v3 = vld [vmem:[%s1471_s4] sm:$0x3] }
   0x7   :  { %313 = vmatprep.mubr.f32.mxu1 %v1202_v1  ;;  %v615_v7 = vld [vmem:[%s1468_s2] sm:$0x3] }
   0x8   :  { %154 = vrot.lane.b32.xlu1 %v151_v12, %s1204_s19  ;;  %152 = vrot.lane.b32.xlu0 %v147_v13, %s1204_s19  ;;  %v140_v17 = vld [vmem:[#allocation2] sm:$0xc]  ;;  %v164_v42 = vld [vmem:[#allocation2 + $0x18] sm:$0xc]  ;;  %v226_v13 = vld [vmem:[%s1472_s3] sm:$0x3] }
   0x9   :  { %v227_v60 = vld [vmem:[#allocation2] sm:$0x3f]  ;;  %v402_v62 = vld [vmem:[#allocation2 + $0x18] sm:$0x3f] }
   0xa   :  { %v715_v2 = vld [vmem:[#allocation2] sm:$0xc] }
   0xc   :  { %174 = vrot.lane.b32.xlu1 %v169_v14, %s1205_s7  ;;  %176 = vrot.lane.b32.xlu0 %v173_v15, %s1205_s7 }
  0x7a   :  { %v1297_v31 = vpop.permute.xlu1 %154 }
  0x7e   :  { %v1299_v32 = vpop.permute.xlu1 %174 }
  0x82   :  { %v42_v16 = vpop.permute.xlu0 %41 }
  0x86   :  { %v1293_v18 = vpop.permute.xlu0 %152 }
  0x87   :  { %v161_v19 = vmul.f32 %v1293_v18, %v140_v17  ;;  %v1306_v34 = vsel %vm156_vm4, %v1293_v18, %v1297_v31  ;;  %v718_v5 = vmul.f32 %v715_v2, %v1293_v18 }
  0x89   :  { %v189_v20 = vrot.slane %v161_v19, 2  ;;  %v728_v8 = vrot.slane %v718_v5, 2  ;;  %v1151_v19 = vld [vmem:[%s1472_s3 + $0x2] sm:$0x3] }
  0x8a   :  { %v1301_v33 = vpop.permute.xlu0 %176 }
  0x8b   :  { %192 = vrot.lane.b32.xlu1 %v189_v20, %s1205_s7  ;;  %v1311_v37 = vsel %vm178_vm5, %v1299_v32, %v1301_v33  ;;  %v185_v45 = vmul.f32 %v1301_v33, %v164_v42 }
  0x8d   :  { %v209_v48 = vrot.slane %v185_v45, 6 }
  0xd9   :  { %v121_v21 = vpop.f32.mrb[0].mxu1 }
  0xda   :  { %v122_v22 = vadd.f32 %v121_v21, %v42_v16  ;;  %v123_v23 = vpop.f32.mrb[1].mxu1  ;;  %v1158_v21 = vld [vmem:[%s1472_s3 + $0x4] sm:$0x3] }
  0xdb   :  { %v124_v24 = vadd.f32 %v123_v23, %v42_v16 }
  0xdc   :  { %vm126_vm2 = vcmp.gt.f32.partialorder %v122_v22, 0.0  ;;  %v128_v25 = vmul.f32 0.1, %v122_v22 }
  0xdd   :  { %vm127_vm3 = vcmp.gt.f32.partialorder %v124_v24, 0.0  ;;  %v129_v26 = vmul.f32 0.1, %v124_v24 }
  0xde   :  { %v130_v27 = vsel %vm126_vm2, %v122_v22, %v128_v25 }
  0xdf   :  { %v134_v28 = vrot.slane %v130_v27, 6  ;;  %v131_v29 = vsel %vm127_vm3, %v124_v24, %v129_v26  ;;  %v1369_v26 = vld [vmem:[%s1466_s0 + $0x8] sm:$0xff] }
  0xe0   :  { %v135_v30 = vrot.slane %v131_v29, 6 }
  0xe1   :  { %138 = vst [vmem:[#allocation2 + $0x8] sm:$0xc] %v134_v28 }
  0xe2   :  { %139 = vst [vmem:[#allocation2 + $0x10] sm:$0xc] %v135_v30  ;;  %v1373_v30 = vcombine.high %v1369_v26, %v1369_v26 }
  0xe8   :  { %v141_v35 = vld [vmem:[#allocation2 + $0x8] sm:$0xc] }
  0xe9   :  { %v142_v36 = vld [vmem:[#allocation2 + $0x10] sm:$0xc]  ;;  %v162_v38 = vmul.f32 %v1306_v34, %v141_v35  ;;  %v183_v40 = vmul.f32 %v1299_v32, %v141_v35 }
  0xea   :  { %v163_v39 = vmul.f32 %v1297_v31, %v142_v36  ;;  %v184_v44 = vmul.f32 %v1311_v37, %v142_v36  ;;  %v509_v36 = vld [vmem:[%s1473_s5] sm:$0xf] }
  0xeb   :  { %v190_v41 = vrot.slane %v162_v38, 2  ;;  %v207_v46 = vrot.slane %v183_v40, 6 }
  0xec   :  { %v191_v43 = vrot.slane %v163_v39, 2  ;;  %v208_v47 = vrot.slane %v184_v44, 6  ;;  %v614_v39 = vld [vmem:[%s1467_s1] sm:$0x3] }
  0xed   :  { %194 = vrot.lane.b32.xlu0 %v190_v41, %s1205_s7 }
  0xee   :  { %196 = vrot.lane.b32.xlu1 %v191_v43, %s1205_s7 }
  0xf1   :  { %210 = vrot.lane.b32.xlu0 %v207_v46, %s1204_s19 }
  0xf2   :  { %212 = vrot.lane.b32.xlu1 %v208_v47, %s1204_s19 }
  0xf5   :  { %214 = vrot.lane.b32.xlu0 %v209_v48, %s1204_s19 }
  0xfd   :  { %v193_v49 = vpop.permute.xlu1 %192 }
 0x15f   :  { %v195_v50 = vpop.permute.xlu0 %194 }
 0x160   :  { %v198_v51 = vsel %vm178_vm5, %v193_v49, %v195_v50  ;;  %v197_v52 = vpop.permute.xlu1 %196 }
 0x161   :  { %202 = vst [vmem:[#allocation2 + $0x8] sm:$0x3] %v198_v51  ;;  %v199_v53 = vsel %vm178_vm5, %v195_v50, %v197_v52 }
 0x162   :  { %203 = vst [vmem:[#allocation2 + $0x10] sm:$0x3] %v199_v53 }
 0x163   :  { %v211_v54 = vpop.permute.xlu0 %210 }
 0x164   :  { %v213_v55 = vpop.permute.xlu1 %212 }
 0x165   :  { %v216_v56 = vsel %vm156_vm4, %v211_v54, %v213_v55 }
 0x166   :  { %220 = vst [vmem:[#allocation2 + $0x8] sm:$0x30] %v216_v56 }
 0x167   :  { %v215_v57 = vpop.permute.xlu0 %214 }
 0x168   :  { %v217_v58 = vsel %vm156_vm4, %v213_v55, %v215_v57 }
 0x169   :  { %221 = vst [vmem:[#allocation2 + $0x10] sm:$0x30] %v217_v58 }
 0x16d   :  { %v224_v59 = vld [vmem:[#allocation2 + $0x8] sm:$0x3f] }
 0x16e   :  { %233 = vrot.lane.b32.xlu1 %v224_v59, %s1206_s8  ;;  %v400_v6 = vld [vmem:[#allocation2 + $0x8] sm:$0x3f] }
 0x170   :  { %v225_v61 = vld [vmem:[#allocation2 + $0x10] sm:$0x3f] }
 0x171   :  { %235 = vrot.lane.b32.xlu0 %v225_v61, %s1206_s8  ;;  %v401_v63 = vld [vmem:[#allocation2 + $0x10] sm:$0x3f] }
 0x172   :  { %231 = vrot.lane.b32.xlu1 %v227_v60, %s1206_s8 }
 0x175   :  { %408 = vrot.lane.b32.xlu0 %v401_v63, %s1207_s20 }
 0x176   :  { %410 = vrot.lane.b32.xlu1 %v402_v62, %s1207_s20 }
 0x179   :  { %406 = vrot.lane.b32.xlu0 %v400_v6, %s1207_s20 }
 0x17a   :  { %498 = vperm.xlu1 %1199, %v495_v3  }
 0x17d   :  { %618 = vperm.xlu0 %1198, %v615_v7  }
 0x17e   :  { %731 = vrot.lane.b32.xlu1 %v728_v8, %s1205_s7 }
 0x1e0   :  { %v234_v9 = vpop.permute.xlu1 %233 }
 0x1e3   :  { %v236_v10 = vpop.permute.xlu0 %235 }
 0x1e4   :  { %v239_v11 = vsel %vm237_vm6, %v234_v9, %v236_v10  ;;  %v232_v12 = vpop.permute.xlu1 %231 }
 0x1e5   :  { %v238_v14 = vsel %vm237_vm6, %v232_v12, %v234_v9  ;;  %1152 = vmatprep.subr.msk.mxu1 %vm244_vm7, %v239_v11  ;;  %v765_v11 = vld [vmem:[#allocation2] sm:$0x3f] }
 0x1e6   :  { %1153 = vmatpush1.msk.msra.mxu1 %vm244_vm7, %v238_v14 }
 0x1e7   :  { %1154 = vmatmul.mubr.msk.f32.vlgmr.msra.gmra.mrb[2].mxu1 %vm240_vm8, %v226_v13  ;;  %1155 = vmatprep.subr.msk.mxu1 %vm244_vm7, %v225_v61  ;;  %v409_v15 = vpop.permute.xlu0 %408  ;;  %v936_v13 = vld [vmem:[#allocation2 + $0x18] sm:$0x3f] }
 0x1e8   :  { %v411_v16 = vpop.permute.xlu1 %410  ;;  %1156 = vmatpush1.msk.msra.mxu1 %vm244_vm7, %v224_v59  ;;  %391 = vmatprep.mubr.f32.mxu1 %v1202_v1  ;;  %v721_v59 = vld [vmem:[#allocation2 + $0x18] sm:$0xc] }
 0x1e9   :  { %v414_v17 = vsel %vm412_vm9, %v409_v15, %v411_v16  ;;  %v724_v62 = vmul.f32 %v721_v59, %v1301_v33 }
 0x1ea   :  { %1159 = vmatprep.subr.msk.mxu1 %vm244_vm7, %v414_v17  ;;  %v510_v17 = vld [vmem:[%s1474_s6] sm:$0xf] }
 0x1eb   :  { %v407_v18 = vpop.permute.xlu0 %406 }
 0x1ec   :  { %v413_v20 = vsel %vm412_vm9, %v407_v18, %v409_v15  ;;  %v1028_v15 = vld [vmem:[%s1471_s4] sm:$0x3] }
 0x1ed   :  { %v1043_v18 = vld [vmem:[%s1474_s6] sm:$0xf] }
 0x1ef   :  { %1157 = vmatmul.mubr.msk.f32.vlgmr.msra.gmra.mrb[2].mxu1 %vm240_vm8, %v1151_v19 }
 0x1f0   :  { %1160 = vmatpush1.msk.msra.mxu1 %vm244_vm7, %v413_v20  ;;  %486 = vmatprep.mubr.f32.mxu1 %v1202_v1 }
 0x1f7   :  { %1161 = vmatmul.mubr.msk.f32.vlgmr.msra.gmra.mrb[2].mxu1 %vm240_vm8, %v1158_v21 }
 0x1f8   :  { %1122 = vmatprep.mubr.f32.mxu1 %v1202_v1 }
 0x1f9   :  { %v499_v22 = vpop.permute.xlu1 %498 }
 0x1fc   :  { %v619_v42 = vpop.permute.xlu0 %618 }
 0x2ca   :  { %v488_v23 = vpop.f32.mrb[2].mxu1 }
 0x2cb   :  { %v501_v24 = vadd.f32 %v499_v22, %v488_v23  ;;  %v490_v25 = vpop.f32.mrb[3].mxu1  ;;  %v764_v23 = vld [vmem:[%s1472_s3] sm:$0x3] }
 0x2cc   :  { %v502_v27 = vadd.f32 %v499_v22, %v490_v25 }
 0x2cd   :  { %v505_v28 = vmul.f32 0.1, %v501_v24  ;;  %vm503_vm12 = vcmp.gt.f32.partialorder %v501_v24, 0.0 }
 0x2ce   :  { %vm504_vm10 = vcmp.gt.f32.partialorder %v502_v27, 0.0  ;;  %v506_v29 = vmul.f32 0.1, %v502_v27 }
 0x2cf   :  { %v507_v38 = vsel %vm503_vm12, %v501_v24, %v505_v28 }
 0x2d0   :  { %v508_v35 = vsel %vm504_vm10, %v502_v27, %v506_v29 }
 0x2d1   :  { %1162 = vmatprep.subr.msk.mxu0 %vm520_vm11, %v508_v35  ;;  %v1169_v35 = vld [vmem:[%s1472_s3 + $0x2] sm:$0x3] }
 0x2d2   :  { %1163 = vmatpush1.msk.msra.mxu0 %vm520_vm11, %v507_v38  ;;  %v1176_v38 = vld [vmem:[%s1472_s3 + $0x4] sm:$0x3] }
 0x2d3   :  { %1164 = vmatmul.mubr.msk.f32.vlgmr.msra.gmra.mrb[0].mxu0 %vm516_vm13, %v509_v36  ;;  %1166 = vmatprep.subr.msk.mxu0 %vm50_vm0, %v1373_v30 }
 0x2d4   :  { %1167 = vmatpush1.msk.msra.mxu0 %vm50_vm0, %v1369_v26  ;;  %694 = vmatprep.mubr.f32.mxu0 %v1202_v1 }
 0x2d7   :  { %1168 = vmatmul.mubr.msk.f32.vlgmr.msra.gmra.mrb[2].mxu0 %vm46_vm1, %v614_v39 }
 0x2d8   :  { %848 = vmatprep.mubr.f32.mxu0 %v1202_v1 }
 0x3a6   :  { %v1391_v40 = vpop.f32.mrb[0].mxu0 }
 0x3a7   :  { %v1393_v41 = vpop.f32.mrb[1].mxu0 }
 0x3aa   :  { %v696_v43 = vpop.f32.mrb[2].mxu0 }
 0x3ab   :  { %v697_v44 = vadd.f32 %v696_v43, %v619_v42  ;;  %v698_v45 = vpop.f32.mrb[3].mxu0 }
 0x3ac   :  { %v699_v46 = vadd.f32 %v698_v45, %v619_v42 }
 0x3ad   :  { %vm701_vm14 = vcmp.gt.f32.partialorder %v697_v44, 0.0  ;;  %v703_v47 = vmul.f32 0.1, %v697_v44 }
 0x3ae   :  { %vm702_vm15 = vcmp.gt.f32.partialorder %v699_v46, 0.0  ;;  %v704_v48 = vmul.f32 0.1, %v699_v46 }
 0x3af   :  { %v705_v49 = vsel %vm701_vm14, %v697_v44, %v703_v47 }
 0x3b0   :  { %v709_v50 = vrot.slane %v705_v49, 6  ;;  %v706_v51 = vsel %vm702_vm15, %v699_v46, %v704_v48 }
 0x3b1   :  { %v710_v52 = vrot.slane %v706_v51, 6 }
 0x3b2   :  { %713 = vst [vmem:[#allocation2 + $0x8] sm:$0xc] %v709_v50 }
 0x3b3   :  { %714 = vst [vmem:[#allocation2 + $0x10] sm:$0xc] %v710_v52 }
 0x3b9   :  { %v716_v53 = vld [vmem:[#allocation2 + $0x8] sm:$0xc] }
 0x3ba   :  { %v719_v54 = vmul.f32 %v716_v53, %v1306_v34  ;;  %v717_v55 = vld [vmem:[#allocation2 + $0x10] sm:$0xc]  ;;  %v722_v58 = vmul.f32 %v716_v53, %v1299_v32  ;;  %v732_v32 = vpop.permute.xlu1 %731 }
 0x3bb   :  { %v720_v56 = vmul.f32 %v717_v55, %v1297_v31  ;;  %v723_v61 = vmul.f32 %v717_v55, %v1311_v37  ;;  %v748_v31 = vrot.slane %v724_v62, 6 }
 0x3bc   :  { %v729_v57 = vrot.slane %v719_v54, 2  ;;  %v746_v63 = vrot.slane %v722_v58, 6 }
 0x3bd   :  { %v730_v60 = vrot.slane %v720_v56, 2  ;;  %v747_v2 = vrot.slane %v723_v61, 6 }
 0x3be   :  { %733 = vrot.lane.b32.xlu0 %v729_v57, %s1205_s7 }
 0x3bf   :  { %735 = vrot.lane.b32.xlu1 %v730_v60, %s1205_s7 }
 0x3c2   :  { %749 = vrot.lane.b32.xlu0 %v746_v63, %s1204_s19 }
 0x3c3   :  { %751 = vrot.lane.b32.xlu1 %v747_v2, %s1204_s19 }
 0x3c6   :  { %753 = vrot.lane.b32.xlu0 %v748_v31, %s1204_s19 }
 0x430   :  { %v734_v34 = vpop.permute.xlu0 %733 }
 0x431   :  { %v737_v3 = vsel %vm178_vm5, %v732_v32, %v734_v34  ;;  %v736_v37 = vpop.permute.xlu1 %735 }
 0x432   :  { %741 = vst [vmem:[#allocation2 + $0x8] sm:$0x3] %v737_v3  ;;  %v738_v5 = vsel %vm178_vm5, %v734_v34, %v736_v37 }
 0x433   :  { %742 = vst [vmem:[#allocation2 + $0x10] sm:$0x3] %v738_v5 }
 0x434   :  { %v750_v6 = vpop.permute.xlu0 %749 }
 0x435   :  { %v752_v33 = vpop.permute.xlu1 %751 }
 0x436   :  { %v755_v7 = vsel %vm156_vm4, %v750_v6, %v752_v33 }
 0x437   :  { %759 = vst [vmem:[#allocation2 + $0x8] sm:$0x30] %v755_v7 }
 0x438   :  { %v754_v8 = vpop.permute.xlu0 %753 }
 0x439   :  { %v756_v9 = vsel %vm156_vm4, %v752_v33, %v754_v8 }
 0x43a   :  { %760 = vst [vmem:[#allocation2 + $0x10] sm:$0x30] %v756_v9 }
 0x43e   :  { %v762_v10 = vld [vmem:[#allocation2 + $0x8] sm:$0x3f] }
 0x43f   :  { %771 = vrot.lane.b32.xlu1 %v762_v10, %s1206_s8  ;;  %v934_v16 = vld [vmem:[#allocation2 + $0x8] sm:$0x3f] }
 0x441   :  { %v763_v12 = vld [vmem:[#allocation2 + $0x10] sm:$0x3f] }
 0x442   :  { %773 = vrot.lane.b32.xlu0 %v763_v12, %s1206_s8  ;;  %v935_v14 = vld [vmem:[#allocation2 + $0x10] sm:$0x3f] }
 0x443   :  { %769 = vrot.lane.b32.xlu1 %v765_v11, %s1206_s8 }
 0x446   :  { %942 = vrot.lane.b32.xlu0 %v935_v14, %s1207_s20 }
 0x447   :  { %944 = vrot.lane.b32.xlu1 %v936_v13, %s1207_s20 }
 0x44a   :  { %940 = vrot.lane.b32.xlu0 %v934_v16, %s1207_s20 }
 0x44b   :  { %1031 = vperm.xlu1 %1199, %v1028_v15  }
 0x44e   :  { %513 = vperm.xlu0 %1198, %v510_v17  }
 0x44f   :  { %1046 = vperm.xlu1 %1199, %v1043_v18  }
 0x4b1   :  { %v772_v19 = vpop.permute.xlu1 %771 }
 0x4b4   :  { %v774_v20 = vpop.permute.xlu0 %773 }
 0x4b5   :  { %v776_v21 = vsel %vm237_vm6, %v772_v19, %v774_v20  ;;  %v770_v22 = vpop.permute.xlu1 %769 }
 0x4b6   :  { %v775_v24 = vsel %vm237_vm6, %v770_v22, %v772_v19  ;;  %1170 = vmatprep.subr.msk.mxu0 %vm244_vm7, %v776_v21 }
 0x4b7   :  { %1171 = vmatpush1.msk.msra.mxu0 %vm244_vm7, %v775_v24 }
 0x4b8   :  { %1172 = vmatmul.mubr.msk.f32.vlgmr.msra.gmra.mrb[4].mxu0 %vm240_vm8, %v764_v23  ;;  %1173 = vmatprep.subr.msk.mxu0 %vm244_vm7, %v763_v12  ;;  %v943_v25 = vpop.permute.xlu0 %942 }
 0x4b9   :  { %v945_v27 = vpop.permute.xlu1 %944  ;;  %1174 = vmatpush1.msk.msra.mxu0 %vm244_vm7, %v762_v10  ;;  %926 = vmatprep.mubr.f32.mxu0 %v1202_v1 }
 0x4ba   :  { %v947_v28 = vsel %vm412_vm9, %v943_v25, %v945_v27 }
 0x4bb   :  { %1177 = vmatprep.subr.msk.mxu0 %vm244_vm7, %v947_v28 }
 0x4bc   :  { %v941_v29 = vpop.permute.xlu0 %940 }
 0x4bd   :  { %v946_v36 = vsel %vm412_vm9, %v941_v29, %v943_v25 }
 0x4c0   :  { %1175 = vmatmul.mubr.msk.f32.vlgmr.msra.gmra.mrb[4].mxu0 %vm240_vm8, %v1169_v35 }
 0x4c1   :  { %1178 = vmatpush1.msk.msra.mxu0 %vm244_vm7, %v946_v36  ;;  %1019 = vmatprep.mubr.f32.mxu0 %v1202_v1 }
 0x4c8   :  { %1179 = vmatmul.mubr.msk.f32.vlgmr.msra.gmra.mrb[4].mxu0 %vm240_vm8, %v1176_v38 }
 0x4ca   :  { %v1032_v50 = vpop.permute.xlu1 %1031 }
 0x4cd   :  { %v514_v39 = vpop.permute.xlu0 %513 }
 0x4ce   :  { %v594_v42 = vadd.f32 %v1391_v40, %v514_v39  ;;  %v596_v43 = vadd.f32 %v1393_v41, %v514_v39  ;;  %v1047_v56 = vpop.permute.xlu1 %1046 }
 0x4d0   :  { %vm598_vm0 = vcmp.gt.f32.partialorder %v594_v42, 0.0  ;;  %vm599_vm1 = vcmp.gt.f32.partialorder %v596_v43, 0.0  ;;  %v600_v44 = vmul.f32 0.1, %v594_v42  ;;  %v601_v45 = vmul.f32 0.1, %v596_v43 }
 0x4d2   :  { %v602_v46 = vsel %vm598_vm0, %v594_v42, %v600_v44  ;;  %v603_v47 = vsel %vm599_vm1, %v596_v43, %v601_v45 }
 0x4d3   :  { %v605_v48 = vadd.f32 %v602_v46, %v1261_v0  ;;  %v606_v1 = vadd.f32 %v603_v47, %v1268_v4  ;;  %v1042_v0 = vld [vmem:[%s1473_s5] sm:$0xf] }
 0x4d5   :  { %v609_v49 = vcombine.low %v605_v48, %v606_v1 }
 0x4d7   :  { %611 = vst [vmem:[%s1475_s9] sm:$0xff] %v609_v49 }
 0x59b   :  { %v1021_v51 = vpop.f32.mrb[4].mxu0 }
 0x59c   :  { %v1034_v40 = vadd.f32 %v1032_v50, %v1021_v51  ;;  %v1023_v52 = vpop.f32.mrb[5].mxu0 }
 0x59d   :  { %v1035_v41 = vadd.f32 %v1032_v50, %v1023_v52 }
 0x59e   :  { %v1038_v53 = vmul.f32 0.1, %v1034_v40  ;;  %vm1036_vm2 = vcmp.gt.f32.partialorder %v1034_v40, 0.0 }
 0x59f   :  { %vm1037_vm3 = vcmp.gt.f32.partialorder %v1035_v41, 0.0  ;;  %v1039_v54 = vmul.f32 0.1, %v1035_v41 }
 0x5a0   :  { %v1040_v4 = vsel %vm1036_vm2, %v1034_v40, %v1038_v53 }
 0x5a1   :  { %v1041_v55 = vsel %vm1037_vm3, %v1035_v41, %v1039_v54 }
 0x5a2   :  { %1180 = vmatprep.subr.msk.mxu1 %vm520_vm11, %v1041_v55 }
 0x5a3   :  { %1181 = vmatpush1.msk.msra.mxu1 %vm520_vm11, %v1040_v4 }
 0x5a4   :  { %1182 = vmatmul.mubr.msk.f32.vlgmr.msra.gmra.mrb[4].mxu1 %vm516_vm13, %v1042_v0 }
 0x677   :  { %v1124_v57 = vpop.f32.mrb[4].mxu1 }
 0x678   :  { %v1125_v58 = vadd.f32 %v1124_v57, %v1047_v56  ;;  %v1126_v59 = vpop.f32.mrb[5].mxu1 }
 0x679   :  { %v1127_v60 = vadd.f32 %v1126_v59, %v1047_v56 }
 0x67a   :  { %vm1129_vm4 = vcmp.gt.f32.partialorder %v1125_v58, 0.0  ;;  %v1131_v61 = vmul.f32 0.1, %v1125_v58 }
 0x67b   :  { %vm1130_vm5 = vcmp.gt.f32.partialorder %v1127_v60, 0.0  ;;  %v1132_v62 = vmul.f32 0.1, %v1127_v60 }
 0x67c   :  { %v1133_v63 = vsel %vm1129_vm4, %v1125_v58, %v1131_v61 }
 0x67d   :  { %v1136_v2 = vadd.f32 %v1369_v26, %v1133_v63  ;;  %v1134_v31 = vsel %vm1130_vm5, %v1127_v60, %v1132_v62 }
 0x67e   :  { %v1137_v32 = vadd.f32 %v1134_v31, %v1373_v30 }
 0x680   :  { %v1140_v34 = vcombine.low %v1136_v2, %v1137_v32 }
 0x682   :  { %1183 = vst [vmem:[%s1475_s9 + $0x8] sm:$0xff] %v1140_v34 }

</bundles_post_ra>
